<compile_context>
chip_gen: v6e
topology: v6e:2x2x1
jax: 0.10.0
libtpu: 0.0.40
codegen_flags: <defaults>
</compile_context>

<pallas_src>
import functools

import jax
import jax.numpy as jnp
from jax.experimental import pallas as pl
from jax.experimental.pallas import tpu as pltpu

HID = 32                      # Const.tcn_hidden_channels (assumed)
HPAD = 128                    # lane-dense hidden width (32 -> 128, sliced back later)
KSIZES = (1, 3, 5)            # inception temporal kernel sizes
PAD = max(KSIZES) // 2        # 'same' padding for the widest branch
NTAPS = sum(KSIZES)           # 9 taps total
C_IN = 2                      # 2 filter slices x 1 channel (from unsqueeze(-1))
KDIM = NTAPS * C_IN           # 18 = fused im2col contraction width

# Per-tap offsets into the zero-padded (Tp = T + 2*PAD) time axis.  The
# encoder's time reversal is folded into the weights (see pack_params), so
# these offsets address the *non-reversed* padded signal.
_OFFSETS = []
for _ks in KSIZES:
    _p = _ks // 2
    _OFFSETS.extend(PAD - _p + _k for _k in range(_ks))
_OFFSETS = tuple(_OFFSETS)


# ----------------------------------------------------------------------------
# Pallas kernel: one fused K=18 matmul (bf16 MXU, f32 accumulate) per block of
# TB batch rows + bias + LeakyReLU + time reduction.
# ----------------------------------------------------------------------------
def _ctx_kernel(x_ref, w_ref, b_ref, ctx_ref, *, TB, T):
    """One grid step = TB batch elements of the node chosen by index_of_node.

    x_ref   : (TB*T, KDIM)  bf16  im2col rows of the selected station
    w_ref   : (KDIM, HPAD)  bf16  fused inception taps (time reversal folded)
    b_ref   : (1, HPAD)     f32   fused bias
    ctx_ref : (TB, HPAD)    f32   context rows for this batch block
    """
    hp = ctx_ref.shape[-1]
    # Single MXU push with K=18 (replaces 9 K=2 tap matmuls + VPU adds).
    y = jnp.dot(x_ref[...], w_ref[...],
                preferred_element_type=jnp.float32)          # (TB*T, Hp) f32
    y = y + b_ref[...]                                       # bias (f32 epilogue)
    y = jnp.where(y > 0, y, jnp.float32(0.01) * y)           # LeakyReLU in the TCN
    # Prediction_Encoder: temporal_feature.sum(dim=-1) -> reduce over time.
    ctx_ref[...] = jnp.sum(y.reshape(TB, T, hp), axis=1)     # (TB, Hp)


def _choose_tb(B, T):
    """Batch rows per grid step: aim for TB*T ~ 256 matmul rows.

    Fills the MXU M dimension on v6e/v7x (256-wide) and already saturates
    v5e's 128-wide MXU; for large B this keeps >=2 grid blocks so both v7x
    TensorCores get work (dimension_semantics=("parallel",)).
    """
    tb = max(1, 256 // max(T, 1))
    if tb >= B:
        return B                       # one block covers everything
    return max(8, (tb // 8) * 8)       # multiple of 8 -> clean (TB,128) out tiles


def _run_kernel(x2d, w2d, bias, *, B_pad, TB, T):
    n_blocks = B_pad // TB
    kernel = functools.partial(_ctx_kernel, TB=TB, T=T)
    cost = pl.CostEstimate(
        flops=2 * B_pad * T * KDIM * HPAD,
        transcendentals=0,
        bytes_accessed=(x2d.size * x2d.dtype.itemsize
                        + w2d.size * w2d.dtype.itemsize
                        + bias.size * 4 + B_pad * HPAD * 4),
    )
    grid_spec = pltpu.PrefetchScalarGridSpec(
        num_scalar_prefetch=0,
        grid=(n_blocks,),                       # one step per TB batch rows
        in_specs=[
            # Contiguous (TB*T, 18) im2col slab per step.
            pl.BlockSpec((TB * T, KDIM), lambda i: (i, 0)),
            # Weights / bias: constant index_map -> kept resident in VMEM.
            pl.BlockSpec((KDIM, HPAD), lambda i: (0, 0)),
            pl.BlockSpec((1, HPAD), lambda i: (0, 0)),
        ],
        out_specs=pl.BlockSpec((TB, HPAD), lambda i: (i, 0)),
    )
    return pl.pallas_call(
        kernel,
        grid_spec=grid_spec,
        out_shape=jax.ShapeDtypeStruct((B_pad, HPAD), jnp.float32),
        compiler_params=pltpu.CompilerParams(dimension_semantics=("parallel",)),
        cost_estimate=cost,
    )(x2d, w2d, bias)


# ----------------------------------------------------------------------------
# Parameters (deterministic synthetic init) + fused packing
# ----------------------------------------------------------------------------
def init_params(key, c_in=C_IN, hid=HID):
    keys = jax.random.split(key, 2 * len(KSIZES))
    ws, bs = [], []
    for i, ks in enumerate(KSIZES):
        fan_in = float(c_in * ks)
        ws.append(jax.random.normal(keys[2 * i], (hid, c_in, ks), jnp.float32)
                  / jnp.sqrt(fan_in))
        bs.append(0.05 * jax.random.normal(keys[2 * i + 1], (hid,), jnp.float32))
    return ws, bs


def pack_params(ws, bs):
    """Fuse branches into one (KDIM, HPAD) bf16 matmul operand + (1, HPAD) bias.

    The encoder's time reversal is folded in here: summing over time after an
    elementwise activation makes conv(reverse(x), w) equivalent to
    conv(x, flip(w)) (zero 'same' padding is reversal-symmetric for odd
    kernels), so each branch's taps are flipped instead of flipping the data.
    K ordering is tap-major / channel-minor, matching the wrapper im2col.
    """
    taps = []
    for w in ws:                                   # (H, C, ks), same order as KSIZES
        ks = w.shape[-1]
        for k in range(ks):                        # matches _OFFSETS ordering
            taps.append(w[:, :, ks - 1 - k].T)     # (C, H) -- flipped tap
    w_all = jnp.stack(taps, axis=0)                # (NTAPS, C, H)
    w2d = w_all.reshape(KDIM, HID)                 # single 2D MXU operand
    w2d = jnp.pad(w2d, ((0, 0), (0, HPAD - HID)))  # lane-dense H
    bias = (bs[0] + bs[1] + bs[2])[None, :]        # (1, H)
    bias = jnp.pad(bias, ((0, 0), (0, HPAD - HID)))
    return w2d.astype(jnp.bfloat16), bias.astype(jnp.float32)


# ----------------------------------------------------------------------------
# Forward wrapper (node select FIRST, then tiny layout glue + im2col)
# ----------------------------------------------------------------------------
def context_generator(inputs, index_of_node, params):
    """inputs: (B, N, F, T) float32;  index_of_node: int array of shape (1,)."""
    ws, bs = params
    B, N, F, T = inputs.shape
    assert F >= 2
    # NOTE: clamps out-of-range indices (PyTorch would raise) -- kept explicit.
    idx = jnp.clip(jnp.asarray(index_of_node, jnp.int32).reshape(()), 0, N - 1)

    # FusionLayer.coupling applied FIRST: only the selected station's (B, F, T)
    # slab is read; everything below is N-times smaller than before.
    x = jax.lax.dynamic_index_in_dim(inputs, idx, axis=1, keepdims=False)  # (B, F, T)
    x = x[:, 0:2, :]                                         # (B, 2, T)  filter slices 0:2
    x = jnp.transpose(x, (0, 2, 1))                          # (B, T, C)
    x = jnp.pad(x, ((0, 0), (PAD, PAD), (0, 0)))             # (B, Tp, C)
    # Tiny im2col: 9 shifted taps, tap-major / channel-minor -> (B, T, 18).
    cols = [x[:, off:off + T, :] for off in _OFFSETS]
    xim = jnp.concatenate(cols, axis=-1).astype(jnp.bfloat16)

    w2d, bias = pack_params(ws, bs)

    TB = _choose_tb(B, T)
    n_blocks = pl.cdiv(B, TB)
    B_pad = n_blocks * TB
    if B_pad != B:
        xim = jnp.pad(xim, ((0, B_pad - B), (0, 0), (0, 0)))
    xim2d = xim.reshape(B_pad * T, KDIM)                     # row-major: batch-major rows

    ctx = _run_kernel(xim2d, w2d, bias, B_pad=B_pad, TB=TB, T=T)   # (B_pad, HPAD)
    # Drop batch padding and the padded hidden lanes.
    return ctx[:B, :HID]


# ----------------------------------------------------------------------------
# Pure-JAX reference (explicit time flip, per-branch convs) for validation
# ----------------------------------------------------------------------------
def reference(inputs, index_of_node, params, matmul_dtype=jnp.float32):
    """Faithful reference.  `matmul_dtype` controls the cast of x / w before
    the contraction (accumulation always f32) so the kernel's intentional bf16
    MXU inputs can be validated apples-to-apples."""
    ws, bs = params
    B, N, F, T = inputs.shape
    x = inputs[:, :, 0:2, :][:, :, :, ::-1]                    # slice + time reverse
    x = jnp.transpose(x, (0, 1, 3, 2)).reshape(B * N, T, C_IN)
    xpad = jnp.pad(x, ((0, 0), (PAD, PAD), (0, 0))).astype(matmul_dtype)
    acc = jnp.zeros((B * N, T, HID), jnp.float32)
    for w, ks in zip(ws, KSIZES):
        p = ks // 2
        wc = w.astype(matmul_dtype)
        for k in range(ks):
            o = PAD - p + k
            acc = acc + jnp.einsum('mtc,hc->mth', xpad[:, o:o + T, :], wc[:, :, k],
                                   preferred_element_type=jnp.float32)
    acc = acc + (bs[0] + bs[1] + bs[2])
    acc = jnp.where(acc > 0, acc, 0.01 * acc)
    mid = acc.sum(axis=1).reshape(B, N, HID)
    return mid[:, int(index_of_node[0]), :]


if __name__ == "__main__":
    key = jax.random.PRNGKey(0)
    k_in, k_par = jax.random.split(key)
    B, N, F, T = 2, 6, 3, 8
    inputs = jax.random.normal(k_in, (B, N, F, T), jnp.float32)
    index_of_node = jnp.array([3], dtype=jnp.int32)
    params = init_params(k_par)

    fwd = jax.jit(context_generator)        # fuse the (tiny) wrapper glue ops
    out = jax.block_until_ready(fwd(inputs, index_of_node, params))
    assert out.shape == (B, HID), out.shape

    # Strict check vs a reference using the same bf16 matmul inputs / f32 accum.
    ref_bf16 = reference(inputs, index_of_node, params, matmul_dtype=jnp.bfloat16)
    err = float(jnp.max(jnp.abs(out - ref_bf16)))
    assert jnp.allclose(out, ref_bf16, atol=1e-3, rtol=1e-3), (
        "bf16-matched max abs diff = %g" % err)

    # Loose sanity check vs the full-f32 reference (only bf16 quantization noise).
    ref_f32 = reference(inputs, index_of_node, params, matmul_dtype=jnp.float32)
    err32 = float(jnp.max(jnp.abs(out - ref_f32)))
    assert err32 < 0.25, "f32 reference max abs diff = %g" % err32

    print("KERNEL_OK")
</pallas_src>

<mosaic_0001>
module attributes {stable_mosaic.version = 11 : i64} {
  func.func @_ctx_kernel(%arg0: i32, %arg1: memref<16x18xbf16, #tpu.memory_space<vmem>>, %arg2: memref<18x128xbf16, #tpu.memory_space<vmem>>, %arg3: memref<1x128xf32, #tpu.memory_space<vmem>>, %arg4: memref<2x128xf32, #tpu.memory_space<vmem>>) attributes {dimension_semantics = [#tpu.dimension_semantics<parallel>], iteration_bounds = array<i64: 1>, scalar_prefetch = 0 : i64, scratch_operands = 0 : i64, tpu.core_type = #tpu.core_type<tc>, window_params = [{transform_indices = @transform_0, window_bounds = array<i64: 16, 18>}, {pipeline_mode = #tpu.pipeline_mode<synchronous>, transform_indices = @transform_1, window_bounds = array<i64: 18, 128>}, {pipeline_mode = #tpu.pipeline_mode<synchronous>, transform_indices = @transform_2, window_bounds = array<i64: 1, 128>}, {transform_indices = @transform_3, window_bounds = array<i64: 2, 128>}]} {
    %c0 = arith.constant 0 : index
    %c0_0 = arith.constant 0 : index
    %0 = vector.load %arg1[%c0, %c0_0] : memref<16x18xbf16, #tpu.memory_space<vmem>>, vector<16x18xbf16>
    %c0_1 = arith.constant 0 : index
    %c0_2 = arith.constant 0 : index
    %1 = vector.load %arg2[%c0_1, %c0_2] : memref<18x128xbf16, #tpu.memory_space<vmem>>, vector<18x128xbf16>
    %cst = arith.constant dense<0.000000e+00> : vector<16x128xf32>
    %2 = tpu.matmul %0, %1, %cst {dimension_numbers = #tpu.dot_dimension_numbers<[1], [0], [0], [1], [0, 0, 1, 1], [], []>} : vector<16x18xbf16>, vector<18x128xbf16>, vector<16x128xf32> -> vector<16x128xf32>
    %c0_3 = arith.constant 0 : index
    %c0_4 = arith.constant 0 : index
    %3 = vector.load %arg3[%c0_3, %c0_4] : memref<1x128xf32, #tpu.memory_space<vmem>>, vector<1x128xf32>
    %4 = vector.broadcast %3 : vector<1x128xf32> to vector<16x128xf32>
    %5 = arith.addf %2, %4 : vector<16x128xf32>
    %cst_5 = arith.constant 0.000000e+00 : f32
    %6 = vector.broadcast %cst_5 : f32 to vector<16x128xf32>
    %7 = arith.cmpf ogt, %5, %6 : vector<16x128xf32>
    %cst_6 = arith.constant 0.00999999977 : f32
    %8 = vector.broadcast %cst_6 : f32 to vector<16x128xf32>
    %9 = arith.mulf %8, %5 : vector<16x128xf32>
    %10 = arith.select %7, %5, %9 : vector<16x128xi1>, vector<16x128xf32>
    %11 = vector.shape_cast %10 : vector<16x128xf32> to vector<2x8x128xf32>
    %cst_7 = arith.constant dense<0.000000e+00> : vector<2x128xf32>
    %12 = vector.multi_reduction <add>, %11, %cst_7 [1] : vector<2x8x128xf32> to vector<2x128xf32>
    %c0_8 = arith.constant 0 : index
    %c0_9 = arith.constant 0 : index
    %13 = vector.load %arg4[%c0_8, %c0_9] : memref<2x128xf32, #tpu.memory_space<vmem>>, vector<2x128xf32>
    tpu.vector_store %arg4[%c0_8, %c0_9], %12 {strides = array<i32>} : memref<2x128xf32, #tpu.memory_space<vmem>>, vector<2x128xf32>,
    return
  }
  func.func @transform_0(%arg0: i32) -> (i32, i32) {
    %c0_i32 = arith.constant 0 : i32
    %c0_i32_0 = arith.constant 0 : i32
    return %arg0, %c0_i32 : i32, i32
  }
  func.func @transform_1(%arg0: i32) -> (i32, i32) {
    %c0_i32 = arith.constant 0 : i32
    %c0_i32_0 = arith.constant 0 : i32
    %c0_i32_1 = arith.constant 0 : i32
    return %c0_i32, %c0_i32_0 : i32, i32
  }
  func.func @transform_2(%arg0: i32) -> (i32, i32) {
    %c0_i32 = arith.constant 0 : i32
    %c0_i32_0 = arith.constant 0 : i32
    %c0_i32_1 = arith.constant 0 : i32
    return %c0_i32, %c0_i32_0 : i32, i32
  }
  func.func @transform_3(%arg0: i32) -> (i32, i32) {
    %c0_i32 = arith.constant 0 : i32
    %c0_i32_0 = arith.constant 0 : i32
    return %arg0, %c0_i32 : i32, i32
  }
}

</mosaic_0001>

<bundles_post_ra>
// kernel: context_generator.1
= control target key start
LH: loop header
LB: loop body
LE: loop exit
PB: predicated region body
PF: predicated region fallthrough
CT: control target
= control target key end

     0   :  { %v173_v1 = vmov 0.0   ;;  %vm46_vm0 = vcmask 1040384   ;;  %vm174_vm1 = vmmov 0   ;;  %s211_s0 = inlined_call_operand.vmem [shape: bf16[16,18], index: 0, kind: input, shape index: {}]   ;;  %s212_s1 = inlined_call_operand.vmem [shape: bf16[18,128], index: 1, kind: input, shape index: {}]   ;;  %s213_s2 = inlined_call_operand.vmem [shape: f32[1,128], index: 2, kind: input, shape index: {}]   ;;  %s214_s3 = inlined_call_operand.hbm [shape: f32[2,128], index: 3, kind: output, shape index: {}]  }
   0x1   :  { %v148_v0 = vld [vmem:[%s212_s1 + $0x8] ss:$0 sps:$4 sm:$0x11]   ;;  %137 = vmatprep.subr.bf16.mxu0 %v173_v1  ;;  %v149_v3 = vld [vmem:[%s212_s1] sm:$0xff]   ;;  %141 = vmatprep.mubr.msk.bf16.mxu0 %vm174_vm1, %v173_v1 }
   0x2   :  { %v48_v2 = vsel %vm46_vm0, %v148_v0, 0 }
   0x3   :  { %138 = vmatpush3.bf16.msra.mxu0 %v48_v2 }
   0x4   :  { %8 = vsyncpa [#allocation3], 0  ;;  %139 = vmatprep.subr.bf16.mxu0 %v173_v1  ;;  %v150_v4 = vld [vmem:[%s211_s0] sm:$0xff]   ;;  %vm42_vm2 = vcmask 146432   ;;  %s175_s0 = smov [#allocation2]   ;;  %vm111_vm5 = vcmask 1041409  }
   0x5   :  { %v129_v5 = vld [vmem:[%s213_s2] ss:$0 sm:$0xff]  ;;  %s121_s1 = sshll.u32 %s175_s0, 4  ;;  %s122_s1 = int_to_ptr.vmem [resolvable:$true] %s121_s1 }
   0x6   :  { %s151_s2 = scalar_lea.vmem %s122_s1, 32  ;;  %p156_p1 = scmp.lt.s32.totalorder %s122_s1, %s122_s1 }
   0x7   :  { %140 = vmatpush3.bf16.msra.mxu0 %v149_v3  ;;  %p152_p0 = scmp.ne.s32.totalorder %s122_s1, %s151_s2  ;;  %p157_p2 = scmp.lt.s32.totalorder %s151_s2, %s151_s2 }
   0x9   :  { %p158_p3 = por %p157_p2, %p156_p1 }
   0xa   :  { %142 = vmatmul.mubr.msk.bf16.vlgmr.msra.gmra.mxu0 %vm42_vm2, %v150_v4 }
   0xb   :  { %p159_p4 = pnand %p158_p3, %p152_p0 }
  0xca   :  { %v84_v6 = vpop.f32.mrf.mxu0 }
  0xcb   :  { %v85_v7 = vadd.f32 %v129_v5, %v84_v6 }
  0xcc   :  { %v143_v8 = vpop.f32.mrf.mxu0 }
  0xcd   :  { %vm91_vm3 = vcmp.gt.f32.partialorder %v85_v7, 0.0  ;;  %v93_v9 = vmul.f32 0.01, %v85_v7 }
  0xce   :  { %v87_v10 = vpop.f32.mrf.mxu0 }
  0xcf   :  { %v95_v11 = vsel %vm91_vm3, %v85_v7, %v93_v9  ;;  %v88_v12 = vadd.f32 %v129_v5, %v87_v10 }
  0xd0   :  { %v97_v13 = vrot.slane %v95_v11, 4  ;;  %v144_v14 = vpop.f32.mrf.mxu0 }
  0xd1   :  { %vm92_vm4 = vcmp.gt.f32.partialorder %v88_v12, 0.0  ;;  %v94_v15 = vmul.f32 0.01, %v88_v12 }
  0xd2   :  { %v98_v16 = vadd.f32 %v97_v13, %v95_v11 }
  0xd3   :  { %v96_v17 = vsel %vm92_vm4, %v88_v12, %v94_v15 }
  0xd4   :  { %v99_v18 = vrot.slane %v98_v16, 2  ;;  %v103_v19 = vrot.slane %v96_v17, 4 }
  0xd6   :  { %v100_v20 = vadd.f32 %v99_v18, %v98_v16  ;;  %v104_v21 = vadd.f32 %v103_v19, %v96_v17 }
  0xd8   :  { %v105_v22 = vrot.slane %v104_v21, 2  ;;  %v101_v24 = vrot.slane %v100_v20, 1 }
  0xda   :  { %v106_v23 = vadd.f32 %v105_v22, %v104_v21  ;;  %v102_v26 = vadd.f32 %v101_v24, %v100_v20 }
  0xdc   :  { %v107_v25 = vrot.slane %v106_v23, 1 }
  0xde   :  { %v108_v27 = vadd.f32 %v107_v25, %v106_v23 }
  0xe0   :  { %v112_v28 = vsel %vm111_vm5, %v108_v27, %v102_v26 }
  0xe1   :  { %114 = vst [vmem:[#allocation2] sm:$0x3] %v112_v28 }
  0xe2   :  { %162 = shalt.err (!%p159_p4)
}
  0xe3   :  { %124 = dma.vmem_to_hbm [thread:$0]  %s122_s1, 32, %s214_s3, [#allocation3]  }
  0xe4   :  { %171 = dma.done.wait [#allocation3], 32  }
  0xe5   :  { %172 = vsyncadd [#allocation3], 4294967264 }
  0xe6   :  { %128 = vsyncpa [#allocation3], 1 }

</bundles_post_ra>
